<compile_context>
chip_gen: v6e
topology: v6e:2x2x1
jax: 0.10.0
libtpu: 0.0.40
codegen_flags: <defaults>
</compile_context>

<pallas_src>
import functools

import jax
import jax.numpy as jnp
import numpy as np
from jax import lax
from jax.experimental import pallas as pl
from jax.experimental.pallas import tpu as pltpu


def _round_up(x, m):
    return (x + m - 1) // m * m


# ----------------------------------------------------------------------------
# Pallas kernel 1: fused EMA parameter update
#   out = old + (1 - beta) * (new - old)   ( == old*beta + (1-beta)*new )
# ----------------------------------------------------------------------------
_EMA_LANES = 1024          # last dim: multiple of 128 -> unmasked vld/vst, full lanes
_EMA_MAX_TILE_ROWS = 512   # (512, 1024) f32 block = 2 MiB; 3 arrays x 2 buffers = 12 MiB
                           # -> fits the default scoped VMEM on v5e/v6e/v7x.
_EMA_VMEM_LIMIT = 32 * 1024 * 1024


def _ema_layout(n_elems):
    """Packed (rows, 1024) layout + tile rows for n_elems flattened parameters."""
    rows_raw = max(1, pl.cdiv(n_elems, _EMA_LANES))
    rows8 = _round_up(rows_raw, 8)                 # full-sublane blocks
    tile = min(_EMA_MAX_TILE_ROWS, rows8)
    rows = _round_up(rows8, tile)                  # rows % tile == 0
    return rows, tile


def _ema_kernel(old_ref, new_ref, out_ref, *, one_minus_beta):
    # Blend in f32 regardless of storage dtype (bf16-safe), cast back on store.
    old = old_ref[...].astype(jnp.float32)
    new = new_ref[...].astype(jnp.float32)
    out_ref[...] = (old + one_minus_beta * (new - old)).astype(out_ref.dtype)


def _ema_fused_2d(old2d, new2d, beta, tile_rows):
    """old2d/new2d: (rows, _EMA_LANES), rows % tile_rows == 0."""
    rows, lanes = old2d.shape
    return pl.pallas_call(
        functools.partial(_ema_kernel, one_minus_beta=1.0 - float(beta)),
        out_shape=jax.ShapeDtypeStruct((rows, lanes), old2d.dtype),
        grid=(rows // tile_rows,),
        in_specs=[pl.BlockSpec((tile_rows, lanes), lambda i: (i, 0)),
                  pl.BlockSpec((tile_rows, lanes), lambda i: (i, 0))],
        out_specs=pl.BlockSpec((tile_rows, lanes), lambda i: (i, 0)),
        input_output_aliases={0: 0},  # EMA is semantically in-place on `old`
        compiler_params=pltpu.CompilerParams(
            dimension_semantics=("parallel",),
            vmem_limit_bytes=_EMA_VMEM_LIMIT),
    )(old2d, new2d)


def ema_update_average(old, new, beta):
    """Standalone update_average for a single tensor (API parity with PyTorch)."""
    if old is None:
        return new
    old = jnp.asarray(old)
    new = jnp.asarray(new)
    n = int(old.size)
    rows, tile = _ema_layout(n)
    pad = rows * _EMA_LANES - n
    o2 = jnp.pad(old.reshape(-1), (0, pad)).reshape(rows, _EMA_LANES)
    n2 = jnp.pad(new.reshape(-1).astype(old.dtype), (0, pad)).reshape(rows, _EMA_LANES)
    out = _ema_fused_2d(o2, n2, beta, tile)
    return out.reshape(-1)[:n].reshape(old.shape)


# ----------------------------------------------------------------------------
# Pallas kernel 2: inner model forward — Conv2d(Cin, Cout, k=3, padding=1)
#   im2col (lane axis = H*W) built in VMEM scratch + single MXU matmul.
#   Halo ("SAME" zero padding) handled inside the kernel: no wrapper-side jnp.pad.
# ----------------------------------------------------------------------------
def _conv3x3_kernel(w_ref, b_ref, x_ref, o_ref, patch_ref, *, H, W, Cin, Cout):
    # w_ref:     VMEM f32[Cout_pad, K_pad]  im2col weights, col index = (ky*3+kx)*Cin + ci
    # b_ref:     VMEM f32[Cout, 1]
    # x_ref:     VMEM f32[1, Cin, H*W]      NC(H*W), lane-dense
    # o_ref:     VMEM f32[1, Cout, H*W]
    # patch_ref: VMEM f32[K_pad, H*W]       im2col patch scratch
    HW = H * W
    patch_ref[...] = jnp.zeros_like(patch_ref)   # zero halo + contraction padding rows
    x = x_ref[0]                                 # (Cin, HW)

    # Hoisted column-validity masks for the +/-1 x-shifts (destination column c,
    # source column c+dx must stay inside [0, W)).  Computed ONCE - JAX does not
    # CSE broadcast/iota, so building these inside the 9-tap loop repeats VALU work.
    col = lax.broadcasted_iota(jnp.int32, (Cin, HW), 1) % W
    left_ok = col >= 1            # valid destinations when dx == -1
    right_ok = col < (W - 1)      # valid destinations when dx == +1

    for ky in range(3):
        for kx in range(3):
            dy, dx = ky - 1, kx - 1
            s = dy * W + dx            # flat source offset: patch[p] = x[p + s] (if valid)
            lo = max(0, -s)            # first valid destination flat position
            L = HW - abs(s)            # copied length (row validity handled by zero-fill)
            src = x[:, lo + s: lo + s + L]               # (Cin, L), static slice
            if dx == -1:
                src = jnp.where(left_ok[:, lo: lo + L], src, 0.0)
            elif dx == 1:
                src = jnp.where(right_ok[:, lo: lo + L], src, 0.0)
            t = ky * 3 + kx
            patch_ref[pl.ds(t * Cin, Cin), pl.ds(lo, L)] = src.astype(jnp.float32)

    # Single MXU matmul: (Cout_pad, K_pad) @ (K_pad, H*W) -> (Cout_pad, H*W)
    acc = jnp.dot(w_ref[...], patch_ref[...], preferred_element_type=jnp.float32)
    o_ref[0] = (acc[:Cout, :] + b_ref[...]).astype(o_ref.dtype)


def conv2d_3x3_same(x, w, b):
    """x: f32[B, Cin, H, W] (NCHW), w: f32[Cout, Cin, 3, 3] (OIHW), b: f32[Cout]."""
    B, Cin, H, W = x.shape
    Cout = w.shape[0]
    HW = H * W
    K = Cin * 9
    K_pad = _round_up(K, 128)        # MXU-friendly contraction padding (zeros)
    Cout_pad = _round_up(Cout, 8)    # full-sublane LHS

    x_flat = x.reshape(B, Cin, HW)   # free reshape; lane axis becomes H*W (lane-dense)
    # im2col weight matrix: w_mat[co, (ky*3+kx)*Cin + ci] = w[co, ci, ky, kx]
    w_mat = jnp.transpose(w, (0, 2, 3, 1)).reshape(Cout, K).astype(jnp.float32)
    w_mat = jnp.pad(w_mat, ((0, Cout_pad - Cout), (0, K_pad - K)))
    b2 = b.reshape(Cout, 1).astype(jnp.float32)

    # TODO(synk): for large H/W/Cin, tile over H with a 2-row halo instead of loading the
    #             whole (Cin, H*W) image per grid step (v7x 64 MiB VMEM budget).
    out = pl.pallas_call(
        functools.partial(_conv3x3_kernel, H=H, W=W, Cin=Cin, Cout=Cout),
        out_shape=jax.ShapeDtypeStruct((B, Cout, HW), x.dtype),
        grid=(B,),
        in_specs=[
            pl.BlockSpec((Cout_pad, K_pad), lambda bi: (0, 0)),   # weights (resident)
            pl.BlockSpec((Cout, 1), lambda bi: (0, 0)),           # bias (resident)
            pl.BlockSpec((1, Cin, HW), lambda bi: (bi, 0, 0)),    # activations
        ],
        out_specs=pl.BlockSpec((1, Cout, HW), lambda bi: (bi, 0, 0)),
        scratch_shapes=[pltpu.VMEM((K_pad, HW), jnp.float32)],
        compiler_params=pltpu.CompilerParams(dimension_semantics=("parallel",)),
    )(w_mat, b2, x_flat)
    return out.reshape(B, Cout, H, W)


# ----------------------------------------------------------------------------
# EmaModel equivalent
# ----------------------------------------------------------------------------
class EmaModelPallas:
    """JAX/Pallas port of EmaModel wrapping a Conv2d(Cin, Cout, 3, padding=1).

    The shadow ("ma") parameters are stored packed in ONE lane-dense (rows, 1024)
    buffer so `update()` is a single fused, input-aliased Pallas call.
    """

    def __init__(self, model_params, beta):
        self.beta = float(beta)
        leaves, self._treedef = jax.tree_util.tree_flatten(model_params)
        leaves = [jnp.asarray(l) for l in leaves]
        self._shapes = [l.shape for l in leaves]
        self._dtypes = [l.dtype for l in leaves]
        self._sizes = [int(np.prod(s)) if len(s) else 1 for s in self._shapes]
        self._n = int(sum(self._sizes))
        self._store_dtype = (self._dtypes[0]
                             if len(set(self._dtypes)) == 1 else jnp.float32)

        self._rows, self._tile = _ema_layout(self._n)
        self._flat = self._pack(leaves)   # "deepcopy" of the wrapped model's params

    # ---- flat <-> tree helpers ----
    def _pack(self, leaves):
        flat = jnp.concatenate(
            [jnp.asarray(l).astype(self._store_dtype).reshape(-1) for l in leaves])
        pad = self._rows * _EMA_LANES - self._n
        if pad:
            flat = jnp.pad(flat, (0, pad))
        return flat.reshape(self._rows, _EMA_LANES)

    def _unpack(self, flat2d):
        flat = flat2d.reshape(-1)[: self._n]
        leaves, off = [], 0
        for shape, dtype, size in zip(self._shapes, self._dtypes, self._sizes):
            leaves.append(flat[off: off + size].reshape(shape).astype(dtype))
            off += size
        return jax.tree_util.tree_unflatten(self._treedef, leaves)

    @property
    def ma_params(self):
        return self._unpack(self._flat)

    # ---- EmaModel API ----
    def update(self, current_params):
        new_leaves = [jnp.asarray(l) for l in jax.tree_util.tree_leaves(current_params)]
        new_flat = self._pack(new_leaves)
        # one fused EMA kernel over every parameter, old buffer aliased to output
        self._flat = _ema_fused_2d(self._flat, new_flat, self.beta, self._tile)

    def update_average(self, old, new):
        return ema_update_average(old, new, self.beta)

    def __call__(self, x):
        p = self.ma_params   # forward(*args) = ma_model(*args)
        return conv2d_3x3_same(x, p["weight"], p["bias"])


# ----------------------------------------------------------------------------
# Demo / self-check
# ----------------------------------------------------------------------------
if __name__ == "__main__":
    key = jax.random.PRNGKey(0)
    k_w0, k_b0, k_w1, k_b1, k_x = jax.random.split(key, 5)

    B, Cin, Cout, H, W = 2, 4, 4, 16, 16
    beta = 0.995

    init_params = {
        "weight": jax.random.normal(k_w0, (Cout, Cin, 3, 3), jnp.float32) * 0.1,
        "bias": jax.random.normal(k_b0, (Cout,), jnp.float32) * 0.1,
    }
    current_params = {
        "weight": jax.random.normal(k_w1, (Cout, Cin, 3, 3), jnp.float32) * 0.1,
        "bias": jax.random.normal(k_b1, (Cout,), jnp.float32) * 0.1,
    }

    ema = EmaModelPallas(init_params, beta)

    # --- EMA update: ONE fused Pallas call over all parameters ---
    ema.update(current_params)
    upd = ema.ma_params

    ref_w = init_params["weight"] * beta + (1.0 - beta) * current_params["weight"]
    ref_b = init_params["bias"] * beta + (1.0 - beta) * current_params["bias"]
    np.testing.assert_allclose(np.asarray(upd["weight"]), np.asarray(ref_w),
                               rtol=1e-6, atol=1e-6)
    np.testing.assert_allclose(np.asarray(upd["bias"]), np.asarray(ref_b),
                               rtol=1e-6, atol=1e-6)

    # standalone update_average path (API parity)
    ua = ema.update_average(init_params["bias"], current_params["bias"])
    np.testing.assert_allclose(np.asarray(ua), np.asarray(ref_b), rtol=1e-6, atol=1e-6)

    # --- forward pass through the shadow model (Pallas im2col + MXU conv kernel) ---
    x = jax.random.normal(k_x, (B, Cin, H, W), jnp.float32)
    y = ema(x)
    y = jax.block_until_ready(y)

    y_ref = lax.conv_general_dilated(
        x, upd["weight"], window_strides=(1, 1), padding="SAME",
        dimension_numbers=("NCHW", "OIHW", "NCHW"),
        precision=lax.Precision.HIGHEST,
    ) + upd["bias"][None, :, None, None]
    # MXU f32 matmul may run at reduced (bf16-pass) precision -> loose-but-meaningful tol
    np.testing.assert_allclose(np.asarray(y), np.asarray(y_ref), rtol=2e-2, atol=2e-2)

    assert y.shape == (B, Cout, H, W)
    print("KERNEL_OK")
</pallas_src>

<mosaic_0001>
module attributes {stable_mosaic.version = 11 : i64} {
  func.func @_ema_kernel(%arg0: i32, %arg1: memref<8x1024xf32, #tpu.memory_space<vmem>>, %arg2: memref<8x1024xf32, #tpu.memory_space<vmem>>, %arg3: memref<8x1024xf32, #tpu.memory_space<vmem>>) attributes {dimension_semantics = [#tpu.dimension_semantics<parallel>], iteration_bounds = array<i64: 1>, scalar_prefetch = 0 : i64, scratch_operands = 0 : i64, tpu.core_type = #tpu.core_type<tc>, window_params = [{transform_indices = @transform_0, window_bounds = array<i64: 8, 1024>}, {transform_indices = @transform_1, window_bounds = array<i64: 8, 1024>}, {transform_indices = @transform_2, window_bounds = array<i64: 8, 1024>}]} {
    %c0 = arith.constant 0 : index
    %c0_0 = arith.constant 0 : index
    %0 = vector.load %arg1[%c0, %c0_0] : memref<8x1024xf32, #tpu.memory_space<vmem>>, vector<8x1024xf32>
    %c0_1 = arith.constant 0 : index
    %c0_2 = arith.constant 0 : index
    %1 = vector.load %arg2[%c0_1, %c0_2] : memref<8x1024xf32, #tpu.memory_space<vmem>>, vector<8x1024xf32>
    %2 = arith.subf %1, %0 : vector<8x1024xf32>
    %cst = arith.constant 5.000000e-03 : f32
    %3 = vector.broadcast %cst : f32 to vector<8x1024xf32>
    %4 = arith.mulf %3, %2 : vector<8x1024xf32>
    %5 = arith.addf %0, %4 : vector<8x1024xf32>
    %c0_3 = arith.constant 0 : index
    %c0_4 = arith.constant 0 : index
    %6 = vector.load %arg3[%c0_3, %c0_4] : memref<8x1024xf32, #tpu.memory_space<vmem>>, vector<8x1024xf32>
    tpu.vector_store %arg3[%c0_3, %c0_4], %5 {strides = array<i32>} : memref<8x1024xf32, #tpu.memory_space<vmem>>, vector<8x1024xf32>,
    return
  }
  func.func @transform_0(%arg0: i32) -> (i32, i32) {
    %c0_i32 = arith.constant 0 : i32
    %c0_i32_0 = arith.constant 0 : i32
    return %arg0, %c0_i32 : i32, i32
  }
  func.func @transform_1(%arg0: i32) -> (i32, i32) {
    %c0_i32 = arith.constant 0 : i32
    %c0_i32_0 = arith.constant 0 : i32
    return %arg0, %c0_i32 : i32, i32
  }
  func.func @transform_2(%arg0: i32) -> (i32, i32) {
    %c0_i32 = arith.constant 0 : i32
    %c0_i32_0 = arith.constant 0 : i32
    return %arg0, %c0_i32 : i32, i32
  }
}

</mosaic_0001>

<bundles_post_ra>
// kernel: tpu_custom_call.1
= control target key start
LH: loop header
LB: loop body
LE: loop exit
PB: predicated region body
PF: predicated region fallthrough
CT: control target
= control target key end

     0   :  { %7 = vsyncpa [#allocation3], 0  ;;  %s180_s0 = inlined_call_operand.hbm [shape: f32[8,1024], index: 0, kind: input, shape index: {}, may-alias: {0,2}]   ;;  %s181_s1 = inlined_call_operand.vmem [shape: f32[8,1024], index: 1, kind: input, shape index: {}]   ;;  %s182_s2 = inlined_call_operand.hbm [shape: f32[8,1024], index: 2, kind: output, shape index: {}, may-alias: {0,2}]  }
   0x1   :  { %8 = vsyncpa [#allocation4], 0  ;;  %s133_s9 = smov [#allocation2]  }
   0x2   :  { %s15_s10 = sshll.u32 %s133_s9, 4  ;;  %s16_s10 = int_to_ptr.vmem [resolvable:$true] %s15_s10 }
   0x3   :  { %s97_s11 = scalar_lea.vmem %s16_s10, 1024  ;;  %p102_p1 = scmp.lt.s32.totalorder %s16_s10, %s16_s10 }
   0x4   :  { %p98_p0 = scmp.ne.s32.totalorder %s16_s10, %s97_s11  ;;  %p103_p2 = scmp.lt.s32.totalorder %s97_s11, %s97_s11 }
   0x6   :  { %p104_p3 = por %p103_p2, %p102_p1 }
   0x8   :  { %p105_p4 = pnand %p104_p3, %p98_p0 }
   0xa   :  { %108 = shalt.err (!%p105_p4)
}
   0xb   :  { %18 = dma.hbm_to_vmem [thread:$0]  %s180_s0, 1024, %s16_s10, [#allocation3]  }
   0xc   :  { %129 = dma.done.wait [#allocation3], 1024  }
   0xd   :  { %130 = vsyncadd [#allocation3], 4294966272  ;;  %v24_v0 = vld [vmem:[#allocation2] sm:$0xff]  ;;  %v25_v2 = vld [vmem:[#allocation2 + $0x8] sm:$0xff]  ;;  %s134_s29 = smov [#allocation5]  }
   0xe   :  { %v32_v1 = vld [vmem:[%s181_s1] sm:$0xff]  ;;  %v33_v4 = vld [vmem:[%s181_s1 + $0x8] sm:$0xff]  ;;  %v26_v5 = vld [vmem:[#allocation2 + $0x10] sm:$0xff]  ;;  %s78_s30 = sshll.u32 %s134_s29, 4  ;;  %s79_s30 = int_to_ptr.vmem [resolvable:$true] %s78_s30 }
   0xf   :  { %v40_v3 = vsub.f32 %v32_v1, %v24_v0  ;;  %v34_v6 = vld [vmem:[%s181_s1 + $0x10] sm:$0xff]  ;;  %v41_v7 = vsub.f32 %v33_v4, %v25_v2  ;;  %v27_v9 = vld [vmem:[#allocation2 + $0x18] sm:$0xff]  ;;  %v28_v11 = vld [vmem:[#allocation2 + $0x20] sm:$0xff]  ;;  %p114_p6 = scmp.lt.s32.totalorder %s79_s30, %s79_s30 }
  0x10   :  { %v42_v8 = vsub.f32 %v34_v6, %v26_v5  ;;  %v35_v10 = vld [vmem:[%s181_s1 + $0x18] sm:$0xff]  ;;  %v36_v14 = vld [vmem:[%s181_s1 + $0x20] sm:$0xff]  ;;  %v29_v15 = vld [vmem:[#allocation2 + $0x28] sm:$0xff] }
  0x11   :  { %v48_v12 = vmul.f32 0.005, %v40_v3  ;;  %v43_v13 = vsub.f32 %v35_v10, %v27_v9  ;;  %v37_v16 = vld [vmem:[%s181_s1 + $0x28] sm:$0xff]  ;;  %v49_v17 = vmul.f32 0.005, %v41_v7  ;;  %v44_v19 = vsub.f32 %v36_v14, %v28_v11  ;;  %v30_v21 = vld [vmem:[#allocation2 + $0x30] sm:$0xff] }
  0x12   :  { %v50_v18 = vmul.f32 0.005, %v42_v8  ;;  %v45_v20 = vsub.f32 %v37_v16, %v29_v15  ;;  %v38_v22 = vld [vmem:[%s181_s1 + $0x30] sm:$0xff]  ;;  %v31_v26 = vld [vmem:[#allocation2 + $0x38] sm:$0xff] }
  0x13   :  { %v56_v23 = vadd.f32 %v48_v12, %v24_v0  ;;  %v51_v24 = vmul.f32 0.005, %v43_v13  ;;  %v46_v25 = vsub.f32 %v38_v22, %v30_v21  ;;  %v39_v27 = vld [vmem:[%s181_s1 + $0x38] sm:$0xff]  ;;  %v57_v28 = vadd.f32 %v49_v17, %v25_v2  ;;  %s109_s1 = scalar_lea.vmem %s79_s30, 1024 }
  0x14   :  { %v58_v29 = vadd.f32 %v50_v18, %v26_v5  ;;  %v52_v30 = vmul.f32 0.005, %v44_v19  ;;  %v53_v31 = vmul.f32 0.005, %v45_v20  ;;  %v47_v34 = vsub.f32 %v39_v27, %v31_v26  ;;  %p110_p5 = scmp.ne.s32.totalorder %s79_s30, %s109_s1  ;;  %p115_p7 = scmp.lt.s32.totalorder %s109_s1, %s109_s1 }
  0x15   :  { %64 = vst [vmem:[#allocation5] sm:$0xff] %v56_v23  ;;  %v59_v32 = vadd.f32 %v51_v24, %v27_v9  ;;  %v54_v33 = vmul.f32 0.005, %v46_v25  ;;  %65 = vst [vmem:[#allocation5 + $0x8] sm:$0xff] %v57_v28 }
  0x16   :  { %66 = vst [vmem:[#allocation5 + $0x10] sm:$0xff] %v58_v29  ;;  %v60_v35 = vadd.f32 %v52_v30, %v28_v11  ;;  %v61_v36 = vadd.f32 %v53_v31, %v29_v15  ;;  %v55_v38 = vmul.f32 0.005, %v47_v34  ;;  %p116_p8 = por %p115_p7, %p114_p6 }
  0x17   :  { %67 = vst [vmem:[#allocation5 + $0x18] sm:$0xff] %v59_v32  ;;  %v62_v37 = vadd.f32 %v54_v33, %v30_v21 }
  0x18   :  { %68 = vst [vmem:[#allocation5 + $0x20] sm:$0xff] %v60_v35  ;;  %69 = vst [vmem:[#allocation5 + $0x28] sm:$0xff] %v61_v36  ;;  %v63_v39 = vadd.f32 %v55_v38, %v31_v26  ;;  %p117_p9 = pnand %p116_p8, %p110_p5 }
  0x19   :  { %70 = vst [vmem:[#allocation5 + $0x30] sm:$0xff] %v62_v37 }
  0x1a   :  { %71 = vst [vmem:[#allocation5 + $0x38] sm:$0xff] %v63_v39 }
  0x1b   :  { %120 = shalt.err (!%p117_p9)
}
  0x1c   :  { %81 = dma.vmem_to_hbm [thread:$0]  %s79_s30, 1024, %s182_s2, [#allocation4]  }
  0x1d   :  { %131 = dma.done.wait [#allocation4], 1024  }
  0x1e   :  { %132 = vsyncadd [#allocation4], 4294966272 }
  0x1f   :  { %85 = vsyncpa [#allocation3], 1 }
  0x20   :  { %86 = vsyncpa [#allocation4], 1 }

</bundles_post_ra>
